<compile_context>
chip_gen: v7x
topology: tpu7x:2x2x1
jax: 0.10.0
libtpu: 0.0.40
codegen_flags: <defaults>
</compile_context>

<pallas_src>
import jax
import jax.numpy as jnp
from jax import lax
from jax.experimental import pallas as pl
from jax.experimental.pallas import tpu as pltpu


def _round_up(x, m):
    return (x + m - 1) // m * m


def _pick_tk(kp, max_tk):
    """Largest multiple-of-128 divisor of kp that fits the VMEM budget."""
    if kp <= max_tk:
        return kp                      # single grid step, zero K padding
    best = 128
    for t in range(128, max_tk + 1, 128):
        if kp % t == 0:
            best = t
    return best


# ---------------------------------------------------------------------------
# Final step shared by both kernel variants:
#   text projection, L2 normalize (rsqrt + eps in f32, exp(logit_scale)
#   folded into the image rows), ONE MXU similarity matmul, exact transpose.
# ---------------------------------------------------------------------------
def _finalize(scale_ref, img_e, txt_ref, w_txt_ref, lpi_ref, lpt_ref):
    txt_e = jnp.dot(txt_ref[...], w_txt_ref[...],
                    preferred_element_type=jnp.float32)        # [Bp, D] f32

    scale = scale_ref[0]                  # exp(logit_scale), hoisted to glue
    eps = 1e-12                           # keeps padded all-zero rows at zero
    img_inv = lax.rsqrt(jnp.sum(img_e * img_e, axis=-1, keepdims=True) + eps)
    txt_inv = lax.rsqrt(jnp.sum(txt_e * txt_e, axis=-1, keepdims=True) + eps)
    img_n = img_e * (img_inv * scale)     # scale folded -> no [B,B] multiply
    txt_n = txt_e * txt_inv

    dn = (((1,), (1,)), ((), ()))         # contract the embedding dim
    lpi = lax.dot_general(img_n.astype(jnp.bfloat16),
                          txt_n.astype(jnp.bfloat16), dn,
                          preferred_element_type=jnp.float32)
    lpi_ref[...] = lpi
    lpt_ref[...] = lpi.T                  # bitwise-exact logits_per_text


def _make_kernel(nk):
    """Build the fused kernel; the nk==1 fast path has no accumulator."""
    if nk == 1:
        def kernel(scale_ref, x_ref, w_img_ref, txt_ref, w_txt_ref,
                   lpi_ref, lpt_ref):
            img_e = jnp.dot(x_ref[...], w_img_ref[...],
                            preferred_element_type=jnp.float32)
            _finalize(scale_ref, img_e, txt_ref, w_txt_ref, lpi_ref, lpt_ref)
        return kernel

    def kernel(scale_ref, x_ref, w_img_ref, txt_ref, w_txt_ref,
               lpi_ref, lpt_ref, acc_ref):
        k = pl.program_id(0)

        @pl.when(k == 0)
        def _init():
            acc_ref[...] = jnp.zeros_like(acc_ref)

        # K-tiled image projection partial sum (bf16 operands, f32 acc).
        acc_ref[...] += jnp.dot(x_ref[...], w_img_ref[...],
                                preferred_element_type=jnp.float32)

        @pl.when(k == nk - 1)
        def _fin():
            _finalize(scale_ref, acc_ref[...], txt_ref, w_txt_ref,
                      lpi_ref, lpt_ref)
    return kernel


# ---------------------------------------------------------------------------
# One-time parameter preparation (NOT per forward): cast weights to bf16 and
# pad w_img's K dim to a multiple of 128 so no per-call re-pad is needed.
# ---------------------------------------------------------------------------
def prepare_params(params):
    k, d = params["w_img"].shape
    kp = _round_up(k, 128)
    w_img = params["w_img"].astype(jnp.bfloat16)
    if kp != k:
        w_img = jnp.zeros((kp, d), jnp.bfloat16).at[:k, :].set(w_img)
    return {
        "w_img": w_img,                                        # [Kp, D] bf16
        "w_txt": params["w_txt"].astype(jnp.bfloat16),         # [Dt, D] bf16
        "tok_table": params["tok_table"].astype(jnp.float32),  # [V, Dt] f32
        "logit_scale": jnp.float32(params["logit_scale"]),
    }


# ---------------------------------------------------------------------------
# Forward (glue: flatten, embedding gather + mean-pool, batch padding;
#          hot path: one fused pallas_call)
# ---------------------------------------------------------------------------
def contrastive_model_forward(images, text_ids, params, *, max_tk=4096):
    B = images.shape[0]
    x_flat = images.reshape(B, -1)
    K = x_flat.shape[1]

    w_img = params["w_img"]                    # pre-padded bf16 [Kp, D]
    Kp, D = w_img.shape
    assert Kp >= K and Kp % 128 == 0, "call prepare_params() once at init"

    # synthetic text encoder front-end stays in glue:
    # embedding gather (no clean small-scale Pallas gather) + mean-pool over S
    tok_emb = jnp.take(params["tok_table"], text_ids, axis=0)   # [B, S, Dt]
    pooled = jnp.mean(tok_emb, axis=1)                          # [B, Dt] f32
    Dt = pooled.shape[1]

    # pad batch to a sublane multiple; pick tk so Kp is never over-padded
    Bp = _round_up(B, 8)
    tk = _pick_tk(Kp, max_tk)
    nk = Kp // tk

    x_p = jnp.zeros((Bp, Kp), jnp.bfloat16).at[:B, :K].set(
        x_flat.astype(jnp.bfloat16))                            # bf16 in glue
    txt_p = jnp.zeros((Bp, Dt), jnp.bfloat16).at[:B, :].set(
        pooled.astype(jnp.bfloat16))
    w_txt = params["w_txt"]

    # exp(logit_scale) hoisted out of the kernel; passed as an SMEM scalar.
    scale = jnp.exp(params["logit_scale"]).reshape(1).astype(jnp.float32)

    kernel = _make_kernel(nk)
    scratch = [] if nk == 1 else [pltpu.VMEM((Bp, D), jnp.float32)]

    lpi_p, lpt_p = pl.pallas_call(
        kernel,
        out_shape=(jax.ShapeDtypeStruct((Bp, Bp), jnp.float32),
                   jax.ShapeDtypeStruct((Bp, Bp), jnp.float32)),
        grid=(nk,),
        in_specs=[
            pl.BlockSpec(memory_space=pltpu.MemorySpace.SMEM),   # exp(logit_scale)
            pl.BlockSpec((Bp, tk), lambda k: (0, k)),            # image K tiles
            pl.BlockSpec((tk, D), lambda k: (k, 0)),             # w_img K tiles
            pl.BlockSpec((Bp, Dt), lambda k: (0, 0)),            # pooled text (resident)
            pl.BlockSpec((Dt, D), lambda k: (0, 0)),             # w_txt (resident)
        ],
        out_specs=(pl.BlockSpec((Bp, Bp), lambda k: (0, 0)),
                   pl.BlockSpec((Bp, Bp), lambda k: (0, 0))),
        scratch_shapes=scratch,
        compiler_params=pltpu.CompilerParams(
            # the single grid axis is the K reduction -> "arbitrary";
            # 32 MiB scoped VMEM is safe on v5e/v6e/v7x at these tile sizes.
            dimension_semantics=("arbitrary",),
            vmem_limit_bytes=32 * 1024 * 1024),
    )(scale, x_p, w_img, txt_p, w_txt)

    # strip batch padding (padded rows/cols are exactly zero)
    return lpi_p[:B, :B], lpt_p[:B, :B]


# pure-JAX reference with the same bf16/f32 mixed precision (sanity check)
def _reference_forward(images, text_ids, raw_params):
    B = images.shape[0]
    x = images.reshape(B, -1)
    img_e = jnp.dot(x.astype(jnp.bfloat16),
                    raw_params["w_img"].astype(jnp.bfloat16),
                    preferred_element_type=jnp.float32)
    tok = jnp.take(raw_params["tok_table"], text_ids, axis=0)
    txt_e = jnp.dot(jnp.mean(tok, axis=1).astype(jnp.bfloat16),
                    raw_params["w_txt"].astype(jnp.bfloat16),
                    preferred_element_type=jnp.float32)
    img_n = img_e / jnp.linalg.norm(img_e, axis=-1, keepdims=True)
    txt_n = txt_e / jnp.linalg.norm(txt_e, axis=-1, keepdims=True)
    lpi = jnp.exp(raw_params["logit_scale"]) * jnp.dot(
        img_n.astype(jnp.bfloat16), txt_n.astype(jnp.bfloat16).T,
        preferred_element_type=jnp.float32)
    return lpi, lpi.T


if __name__ == "__main__":
    key = jax.random.PRNGKey(0)
    k_img, k_txt, k_wimg, k_tok, k_wtxt = jax.random.split(key, 5)

    # small shapes consistent with the forward
    B, C, H, W = 4, 3, 16, 16        # images: NCHW, K = 768 (multiple of 128)
    S, VOCAB = 8, 100                # text: token ids of length S
    D_TXT = 128                      # padded to a full 128-lane vreg
    D = 128                          # shared embedding dim
    TEMPERATURE = 0.07

    images = jax.random.normal(k_img, (B, C, H, W), jnp.float32)
    text_ids = jax.random.randint(k_txt, (B, S), 0, VOCAB, dtype=jnp.int32)

    raw_params = {
        "w_img": 0.02 * jax.random.normal(k_wimg, (C * H * W, D), jnp.float32),
        "tok_table": 0.02 * jax.random.normal(k_tok, (VOCAB, D_TXT), jnp.float32),
        "w_txt": 0.02 * jax.random.normal(k_wtxt, (D_TXT, D), jnp.float32),
        # nn.Parameter(ones([]) * 1/temperature); forward applies .exp()
        "logit_scale": jnp.float32(1.0 / TEMPERATURE),
    }
    # one-time weight prep (cast + K-pad) -- never repeated per forward call
    params = prepare_params(raw_params)

    fwd = jax.jit(contrastive_model_forward)
    logits_per_image, logits_per_text = fwd(images, text_ids, params)
    jax.block_until_ready((logits_per_image, logits_per_text))

    assert logits_per_image.shape == (B, B)
    assert logits_per_text.shape == (B, B)
    assert bool(jnp.all(jnp.isfinite(logits_per_image)))
    # logits_per_text is an exact in-kernel transpose of logits_per_image
    assert bool(jnp.array_equal(logits_per_image, logits_per_text.T))

    # loose numerical check against the pure-JAX reference (same bf16 math)
    ref_lpi, _ = _reference_forward(images, text_ids, raw_params)
    rel_err = float(jnp.max(jnp.abs(logits_per_image - ref_lpi)) /
                    (jnp.max(jnp.abs(ref_lpi)) + 1e-6))
    assert rel_err < 5e-2, rel_err

    print("KERNEL_OK")
</pallas_src>

<mosaic_0001>
module attributes {stable_mosaic.version = 11 : i64} {
  func.func @kernel(%arg0: i32, %arg1: memref<1xf32, #tpu.memory_space<smem>>, %arg2: memref<8x768xbf16, #tpu.memory_space<vmem>>, %arg3: memref<768x128xbf16, #tpu.memory_space<vmem>>, %arg4: memref<8x128xbf16, #tpu.memory_space<vmem>>, %arg5: memref<128x128xbf16, #tpu.memory_space<vmem>>, %arg6: memref<8x8xf32, #tpu.memory_space<vmem>>, %arg7: memref<8x8xf32, #tpu.memory_space<vmem>>) attributes {dimension_semantics = [#tpu.dimension_semantics<arbitrary>], iteration_bounds = array<i64: 1>, scalar_prefetch = 0 : i64, scratch_operands = 0 : i64, tpu.core_type = #tpu.core_type<tc>, window_params = [{transform_indices = @transform_0, window_bounds = array<i64: 1>}, {transform_indices = @transform_1, window_bounds = array<i64: 8, 768>}, {transform_indices = @transform_2, window_bounds = array<i64: 768, 128>}, {pipeline_mode = #tpu.pipeline_mode<synchronous>, transform_indices = @transform_3, window_bounds = array<i64: 8, 128>}, {pipeline_mode = #tpu.pipeline_mode<synchronous>, transform_indices = @transform_4, window_bounds = array<i64: 128, 128>}, {pipeline_mode = #tpu.pipeline_mode<synchronous>, transform_indices = @transform_5, window_bounds = array<i64: 8, 8>}, {pipeline_mode = #tpu.pipeline_mode<synchronous>, transform_indices = @transform_6, window_bounds = array<i64: 8, 8>}]} {
    %c0 = arith.constant 0 : index
    %c0_0 = arith.constant 0 : index
    %0 = vector.load %arg2[%c0, %c0_0] : memref<8x768xbf16, #tpu.memory_space<vmem>>, vector<8x768xbf16>
    %c0_1 = arith.constant 0 : index
    %c0_2 = arith.constant 0 : index
    %1 = vector.load %arg3[%c0_1, %c0_2] : memref<768x128xbf16, #tpu.memory_space<vmem>>, vector<768x128xbf16>
    %cst = arith.constant dense<0.000000e+00> : vector<8x128xf32>
    %2 = tpu.matmul %0, %1, %cst {dimension_numbers = #tpu.dot_dimension_numbers<[1], [0], [0], [1], [0, 0, 1, 1], [], []>} : vector<8x768xbf16>, vector<768x128xbf16>, vector<8x128xf32> -> vector<8x128xf32>
    %c0_3 = arith.constant 0 : index
    %c0_4 = arith.constant 0 : index
    %3 = vector.load %arg4[%c0_3, %c0_4] : memref<8x128xbf16, #tpu.memory_space<vmem>>, vector<8x128xbf16>
    %c0_5 = arith.constant 0 : index
    %c0_6 = arith.constant 0 : index
    %4 = vector.load %arg5[%c0_5, %c0_6] : memref<128x128xbf16, #tpu.memory_space<vmem>>, vector<128x128xbf16>
    %cst_7 = arith.constant dense<0.000000e+00> : vector<8x128xf32>
    %5 = tpu.matmul %3, %4, %cst_7 {dimension_numbers = #tpu.dot_dimension_numbers<[1], [0], [0], [1], [0, 0, 1, 1], [], []>} : vector<8x128xbf16>, vector<128x128xbf16>, vector<8x128xf32> -> vector<8x128xf32>
    %c0_8 = arith.constant 0 : index
    %6 = memref.load %arg1[%c0_8] : memref<1xf32, #tpu.memory_space<smem>>
    %7 = arith.mulf %2, %2 : vector<8x128xf32>
    %cst_9 = arith.constant dense<0.000000e+00> : vector<8xf32>
    %8 = vector.multi_reduction <add>, %7, %cst_9 [1] : vector<8x128xf32> to vector<8xf32>
    %9 = vector.shape_cast %8 : vector<8xf32> to vector<8x1xf32>
    %cst_10 = arith.constant 9.99999996E-13 : f32
    %10 = vector.broadcast %cst_10 : f32 to vector<8x1xf32>
    %11 = arith.addf %9, %10 : vector<8x1xf32>
    %12 = math.rsqrt %11 : vector<8x1xf32>
    %13 = arith.mulf %5, %5 : vector<8x128xf32>
    %cst_11 = arith.constant dense<0.000000e+00> : vector<8xf32>
    %14 = vector.multi_reduction <add>, %13, %cst_11 [1] : vector<8x128xf32> to vector<8xf32>
    %15 = vector.shape_cast %14 : vector<8xf32> to vector<8x1xf32>
    %cst_12 = arith.constant 9.99999996E-13 : f32
    %16 = vector.broadcast %cst_12 : f32 to vector<8x1xf32>
    %17 = arith.addf %15, %16 : vector<8x1xf32>
    %18 = math.rsqrt %17 : vector<8x1xf32>
    %19 = vector.broadcast %6 : f32 to vector<8x1xf32>
    %20 = arith.mulf %12, %19 : vector<8x1xf32>
    %21 = vector.broadcast %20 : vector<8x1xf32> to vector<8x128xf32>
    %22 = arith.mulf %2, %21 : vector<8x128xf32>
    %23 = vector.broadcast %18 : vector<8x1xf32> to vector<8x128xf32>
    %24 = arith.mulf %5, %23 : vector<8x128xf32>
    %25 = arith.truncf %22 : vector<8x128xf32> to vector<8x128xbf16>
    %26 = arith.truncf %24 : vector<8x128xf32> to vector<8x128xbf16>
    %cst_13 = arith.constant dense<0.000000e+00> : vector<8x8xf32>
    %27 = tpu.matmul %25, %26, %cst_13 {dimension_numbers = #tpu.dot_dimension_numbers<[1], [1], [0], [0], [0, 0, 1, 0], [], []>} : vector<8x128xbf16>, vector<8x128xbf16>, vector<8x8xf32> -> vector<8x8xf32>
    %c0_14 = arith.constant 0 : index
    %c0_15 = arith.constant 0 : index
    %28 = vector.load %arg6[%c0_14, %c0_15] : memref<8x8xf32, #tpu.memory_space<vmem>>, vector<8x8xf32>
    tpu.vector_store %arg6[%c0_14, %c0_15], %27 {strides = array<i32>} : memref<8x8xf32, #tpu.memory_space<vmem>>, vector<8x8xf32>,
    %29 = tpu.transpose %27, [1, 0] : vector<8x8xf32> -> vector<8x8xf32>
    %c0_16 = arith.constant 0 : index
    %c0_17 = arith.constant 0 : index
    %30 = vector.load %arg7[%c0_16, %c0_17] : memref<8x8xf32, #tpu.memory_space<vmem>>, vector<8x8xf32>
    tpu.vector_store %arg7[%c0_16, %c0_17], %29 {strides = array<i32>} : memref<8x8xf32, #tpu.memory_space<vmem>>, vector<8x8xf32>,
    return
  }
  func.func @transform_0(%arg0: i32) -> i32 {
    %c0_i32 = arith.constant 0 : i32
    %c0_i32_0 = arith.constant 0 : i32
    return %c0_i32 : i32
  }
  func.func @transform_1(%arg0: i32) -> (i32, i32) {
    %c0_i32 = arith.constant 0 : i32
    %c0_i32_0 = arith.constant 0 : i32
    return %c0_i32, %arg0 : i32, i32
  }
  func.func @transform_2(%arg0: i32) -> (i32, i32) {
    %c0_i32 = arith.constant 0 : i32
    %c0_i32_0 = arith.constant 0 : i32
    return %arg0, %c0_i32 : i32, i32
  }
  func.func @transform_3(%arg0: i32) -> (i32, i32) {
    %c0_i32 = arith.constant 0 : i32
    %c0_i32_0 = arith.constant 0 : i32
    %c0_i32_1 = arith.constant 0 : i32
    return %c0_i32, %c0_i32_0 : i32, i32
  }
  func.func @transform_4(%arg0: i32) -> (i32, i32) {
    %c0_i32 = arith.constant 0 : i32
    %c0_i32_0 = arith.constant 0 : i32
    %c0_i32_1 = arith.constant 0 : i32
    return %c0_i32, %c0_i32_0 : i32, i32
  }
  func.func @transform_5(%arg0: i32) -> (i32, i32) {
    %c0_i32 = arith.constant 0 : i32
    %c0_i32_0 = arith.constant 0 : i32
    %c0_i32_1 = arith.constant 0 : i32
    return %c0_i32, %c0_i32_0 : i32, i32
  }
  func.func @transform_6(%arg0: i32) -> (i32, i32) {
    %c0_i32 = arith.constant 0 : i32
    %c0_i32_0 = arith.constant 0 : i32
    %c0_i32_1 = arith.constant 0 : i32
    return %c0_i32, %c0_i32_0 : i32, i32
  }
}

</mosaic_0001>

<bundles_post_ra>
// kernel: contrastive_model_forward.1
= control target key start
LH: loop header
LB: loop body
LE: loop exit
PB: predicated region body
PF: predicated region fallthrough
CT: control target
= control target key end

     0   :  { %v990_v39 = vmov 0.0   ;;  %vm991_vm0 = vmmov 0   ;;  %vm714_vm1 = vcmask 64512   ;;  %s1229_s2 = inlined_call_operand.vmem [shape: bf16[768,128], index: 2, kind: input, shape index: {}]   ;;  %s1230_s1 = inlined_call_operand.vmem [shape: bf16[8,768], index: 1, kind: input, shape index: {}]   ;;  %s1231_s4 = inlined_call_operand.vmem [shape: bf16[128,128], index: 4, kind: input, shape index: {}]   ;;  %s1232_s3 = inlined_call_operand.vmem [shape: bf16[8,128], index: 3, kind: input, shape index: {}]   ;;  %s1233_s0 = inlined_call_operand.<no memory space> [shape: f32[1], index: 0, kind: input, shape index: {}]   ;;  %s1234_s5 = inlined_call_operand.vmem [shape: f32[8,8], index: 5, kind: output, shape index: {0}]   ;;  %s1235_s6 = inlined_call_operand.vmem [shape: f32[8,8], index: 6, kind: output, shape index: {1}]  }
   0x1   :  { %v924_v0 = vld [vmem:[%s1229_s2 + $0x40] sm:$0xff]   ;;  %v928_v4 = vld [vmem:[%s1229_s2 + $0x48] sm:$0xff]   ;;  %v932_v8 = vld [vmem:[%s1229_s2 + $0x50] sm:$0xff]  }
   0x2   :  { %v925_v1 = vld [vmem:[%s1229_s2 + $0xc0] sm:$0xff]   ;;  %819 = vmatprep.subr.bf16.mxu0 %v924_v0  ;;  %v929_v5 = vld [vmem:[%s1229_s2 + $0xc8] sm:$0xff]   ;;  %v933_v9 = vld [vmem:[%s1229_s2 + $0xd0] sm:$0xff]  }
   0x3   :  { %v926_v2 = vld [vmem:[%s1229_s2] sm:$0xff]   ;;  %841 = vmatprep.subr.bf16.mxu1 %v925_v1  ;;  %v930_v6 = vld [vmem:[%s1229_s2 + $0x8] sm:$0xff]   ;;  %v934_v10 = vld [vmem:[%s1229_s2 + $0x10] sm:$0xff]  }
   0x4   :  { %v927_v3 = vld [vmem:[%s1229_s2 + $0x80] sm:$0xff]   ;;  %820 = vmatpush3.bf16.msra.mxu0 %v926_v2  ;;  %v931_v7 = vld [vmem:[%s1229_s2 + $0x88] sm:$0xff]   ;;  %v935_v11 = vld [vmem:[%s1229_s2 + $0x90] sm:$0xff]  }
   0x5   :  { %842 = vmatpush3.bf16.msra.mxu1 %v927_v3  ;;  %821 = vmatprep.subr.bf16.mxu0 %v928_v4  ;;  %v936_v12 = vld [vmem:[%s1229_s2 + $0x58] sm:$0xff]   ;;  %v940_v16 = vld [vmem:[%s1229_s2 + $0x60] sm:$0xff]   ;;  %v944_v20 = vld [vmem:[%s1229_s2 + $0x68] sm:$0xff]  }
   0x6   :  { %843 = vmatprep.subr.bf16.mxu1 %v929_v5  ;;  %v937_v13 = vld [vmem:[%s1229_s2 + $0xd8] sm:$0xff]   ;;  %v941_v17 = vld [vmem:[%s1229_s2 + $0xe0] sm:$0xff]   ;;  %v945_v21 = vld [vmem:[%s1229_s2 + $0xe8] sm:$0xff]  }
   0x7   :  { %v938_v14 = vld [vmem:[%s1229_s2 + $0x18] sm:$0xff]   ;;  %v942_v18 = vld [vmem:[%s1229_s2 + $0x20] sm:$0xff]   ;;  %v946_v22 = vld [vmem:[%s1229_s2 + $0x28] sm:$0xff]  }
   0x8   :  { %822 = vmatpush3.bf16.msra.mxu0 %v930_v6  ;;  %v939_v15 = vld [vmem:[%s1229_s2 + $0x98] sm:$0xff]   ;;  %v943_v19 = vld [vmem:[%s1229_s2 + $0xa0] sm:$0xff]   ;;  %v947_v23 = vld [vmem:[%s1229_s2 + $0xa8] sm:$0xff]  }
   0x9   :  { %844 = vmatpush3.bf16.msra.mxu1 %v931_v7  ;;  %823 = vmatprep.subr.bf16.mxu0 %v932_v8  ;;  %v948_v24 = vld [vmem:[%s1229_s2 + $0x70] sm:$0xff]   ;;  %v952_v28 = vld [vmem:[%s1229_s2 + $0x78] sm:$0xff]   ;;  %v24_v32 = vld [vmem:[%s1230_s1] sm:$0xff] }
   0xa   :  { %845 = vmatprep.subr.bf16.mxu1 %v933_v9  ;;  %v949_v25 = vld [vmem:[%s1229_s2 + $0xf0] sm:$0xff]   ;;  %v953_v29 = vld [vmem:[%s1229_s2 + $0xf8] sm:$0xff]   ;;  %v25_v33 = vld [vmem:[%s1230_s1 + $0x8] sm:$0xff]  ;;  %v757_v34 = vcombine.low %v24_v32, %v24_v32  ;;  %v758_v35 = vcombine.high %v24_v32, %v24_v32 }
   0xb   :  { %v950_v26 = vld [vmem:[%s1229_s2 + $0x30] sm:$0xff]   ;;  %v954_v30 = vld [vmem:[%s1229_s2 + $0x38] sm:$0xff]   ;;  %v759_v36 = vcombine.low %v25_v33, %v25_v33  ;;  %v760_v37 = vcombine.high %v25_v33, %v25_v33  ;;  %v960_v38 = vld [vmem:[%s1229_s2 + $0x140] sm:$0xff]   ;;  %v668_v33 = vstv %s1233_s0 }
   0xc   :  { %824 = vmatpush3.bf16.msra.mxu0 %v934_v10  ;;  %v951_v27 = vld [vmem:[%s1229_s2 + $0xb0] sm:$0xff]   ;;  %v955_v31 = vld [vmem:[%s1229_s2 + $0xb8] sm:$0xff]   ;;  %v961_v40 = vld [vmem:[%s1229_s2 + $0x100] sm:$0xff]   ;;  %464 = vmatprep.mubr.bf16.mxu0 %v758_v35 }
   0xd   :  { %846 = vmatpush3.bf16.msra.mxu1 %v935_v11  ;;  %825 = vmatprep.subr.bf16.mxu0 %v936_v12  ;;  %v962_v41 = vld [vmem:[%s1231_s4] sm:$0xff]   ;;  %v963_v42 = vld [vmem:[%s1229_s2 + $0x148] sm:$0xff]   ;;  %v966_v45 = vld [vmem:[%s1229_s2 + $0x150] sm:$0xff]  }
   0xe   :  { %847 = vmatprep.subr.bf16.mxu1 %v937_v13  ;;  %504 = vmatprep.mubr.bf16.mxu1 %v760_v37  ;;  %v964_v43 = vld [vmem:[%s1229_s2 + $0x108] sm:$0xff]   ;;  %v968_v46 = vld [vmem:[%s1231_s4 + $0x10] sm:$0xff]   ;;  %v969_v48 = vld [vmem:[%s1229_s2 + $0x158] sm:$0xff]  }
   0xf   :  { %v965_v44 = vld [vmem:[%s1231_s4 + $0x8] sm:$0xff]   ;;  %v967_v47 = vld [vmem:[%s1229_s2 + $0x110] sm:$0xff]   ;;  %v971_v49 = vld [vmem:[%s1231_s4 + $0x18] sm:$0xff]  }
  0x10   :  { %826 = vmatpush3.bf16.msra.mxu0 %v938_v14  ;;  %v970_v50 = vld [vmem:[%s1229_s2 + $0x118] sm:$0xff]   ;;  %v972_v51 = vld [vmem:[%s1229_s2 + $0x160] sm:$0xff]   ;;  %v975_v54 = vld [vmem:[%s1229_s2 + $0x168] sm:$0xff]  }
  0x11   :  { %848 = vmatpush3.bf16.msra.mxu1 %v939_v15  ;;  %827 = vmatprep.subr.bf16.mxu0 %v940_v16  ;;  %v974_v52 = vld [vmem:[%s1231_s4 + $0x20] sm:$0xff]   ;;  %v977_v55 = vld [vmem:[%s1231_s4 + $0x28] sm:$0xff]   ;;  %v978_v57 = vld [vmem:[%s1229_s2 + $0x170] sm:$0xff]  }
  0x12   :  { %849 = vmatprep.subr.bf16.mxu1 %v941_v17  ;;  %v973_v53 = vld [vmem:[%s1229_s2 + $0x120] sm:$0xff]   ;;  %v976_v56 = vld [vmem:[%s1229_s2 + $0x128] sm:$0xff]   ;;  %v26_v58 = vld [vmem:[%s1230_s1 + $0x10] sm:$0xff] }
  0x13   :  { %v980_v59 = vld [vmem:[%s1231_s4 + $0x30] sm:$0xff]   ;;  %v762_v60 = vcombine.high %v26_v58, %v26_v58  ;;  %v981_v62 = vld [vmem:[%s1229_s2 + $0x178] sm:$0xff]   ;;  %v761_v1 = vcombine.low %v26_v58, %v26_v58  ;;  %v552_v2 = vld [vmem:[%s1232_s3] sm:$0xf] }
  0x14   :  { %828 = vmatpush3.bf16.msra.mxu0 %v942_v18  ;;  %v979_v61 = vld [vmem:[%s1229_s2 + $0x130] sm:$0xff]   ;;  %v983_v63 = vld [vmem:[%s1231_s4 + $0x38] sm:$0xff]  }
  0x15   :  { %850 = vmatpush3.bf16.msra.mxu1 %v943_v19  ;;  %829 = vmatprep.subr.bf16.mxu0 %v944_v20  ;;  %v982_v0 = vld [vmem:[%s1229_s2 + $0x138] sm:$0xff]  }
  0x16   :  { %851 = vmatprep.subr.bf16.mxu1 %v945_v21 }
  0x18   :  { %830 = vmatpush3.bf16.msra.mxu0 %v946_v22 }
  0x19   :  { %852 = vmatpush3.bf16.msra.mxu1 %v947_v23  ;;  %831 = vmatprep.subr.bf16.mxu0 %v948_v24 }
  0x1a   :  { %853 = vmatprep.subr.bf16.mxu1 %v949_v25 }
  0x1c   :  { %832 = vmatpush3.bf16.msra.mxu0 %v950_v26 }
  0x1d   :  { %854 = vmatpush3.bf16.msra.mxu1 %v951_v27  ;;  %833 = vmatprep.subr.bf16.mxu0 %v952_v28 }
  0x1e   :  { %855 = vmatprep.subr.bf16.mxu1 %v953_v29 }
  0x20   :  { %834 = vmatpush3.bf16.msra.mxu0 %v954_v30 }
  0x21   :  { %856 = vmatpush3.bf16.msra.mxu1 %v955_v31  ;;  %863 = vmatprep.subr.bf16.mxu0 %v960_v38 }
  0x22   :  { %896 = vmatprep.subr.bf16.mxu1 %v990_v39 }
  0x23   :  { %465 = vmatmul.mubr.bf16.vlgmr.msra.gmra.mrb[0].mxu0 %v757_v34 }
  0x24   :  { %505 = vmatmul.mubr.bf16.vlgmr.msra.gmra.mrb[0].mxu1 %v759_v36  ;;  %864 = vmatpush3.bf16.msra.mxu0 %v961_v40 }
  0x25   :  { %897 = vmatpush3.bf16.msra.mxu1 %v962_v41  ;;  %865 = vmatprep.subr.bf16.mxu0 %v963_v42 }
  0x26   :  { %898 = vmatprep.subr.bf16.mxu1 %v990_v39  ;;  %912 = vmatprep.mubr.msk.bf16.mxu1 %vm991_vm0, %v990_v39 }
  0x27   :  { %544 = vmatprep.mubr.bf16.mxu0 %v762_v60 }
  0x28   :  { %866 = vmatpush3.bf16.msra.mxu0 %v964_v43 }
  0x29   :  { %899 = vmatpush3.bf16.msra.mxu1 %v965_v44  ;;  %867 = vmatprep.subr.bf16.mxu0 %v966_v45 }
  0x2a   :  { %900 = vmatprep.subr.bf16.mxu1 %v990_v39 }
  0x2c   :  { %868 = vmatpush3.bf16.msra.mxu0 %v967_v47 }
  0x2d   :  { %901 = vmatpush3.bf16.msra.mxu1 %v968_v46  ;;  %869 = vmatprep.subr.bf16.mxu0 %v969_v48 }
  0x2e   :  { %902 = vmatprep.subr.bf16.mxu1 %v990_v39 }
  0x30   :  { %870 = vmatpush3.bf16.msra.mxu0 %v970_v50 }
  0x31   :  { %903 = vmatpush3.bf16.msra.mxu1 %v971_v49  ;;  %871 = vmatprep.subr.bf16.mxu0 %v972_v51 }
  0x32   :  { %904 = vmatprep.subr.bf16.mxu1 %v990_v39 }
  0x34   :  { %872 = vmatpush3.bf16.msra.mxu0 %v973_v53 }
  0x35   :  { %905 = vmatpush3.bf16.msra.mxu1 %v974_v52  ;;  %873 = vmatprep.subr.bf16.mxu0 %v975_v54 }
  0x36   :  { %906 = vmatprep.subr.bf16.mxu1 %v990_v39 }
  0x38   :  { %874 = vmatpush3.bf16.msra.mxu0 %v976_v56 }
  0x39   :  { %907 = vmatpush3.bf16.msra.mxu1 %v977_v55  ;;  %875 = vmatprep.subr.bf16.mxu0 %v978_v57 }
  0x3a   :  { %908 = vmatprep.subr.bf16.mxu1 %v990_v39 }
  0x3c   :  { %876 = vmatpush3.bf16.msra.mxu0 %v979_v61 }
  0x3d   :  { %909 = vmatpush3.bf16.msra.mxu1 %v980_v59  ;;  %877 = vmatprep.subr.bf16.mxu0 %v981_v62 }
  0x3e   :  { %910 = vmatprep.subr.bf16.mxu1 %v990_v39 }
  0x40   :  { %878 = vmatpush3.bf16.msra.mxu0 %v982_v0 }
  0x41   :  { %911 = vmatpush3.bf16.msra.mxu1 %v983_v63  ;;  %916 = vmatprep.subr.bf16.mxu0 %v990_v39 }
  0x43   :  { %545 = vmatmul.mubr.bf16.vlgmr.msra.gmra.mrb[4].mxu0 %v761_v1 }
  0x44   :  { %913 = vmatmul.mubr.bf16.vlgmr.msra.gmra.mrb[4].mxu1 %v552_v2  ;;  %918 = vmatprep.mubr.msk.bf16.mxu0 %vm991_vm0, %v990_v39 }
  0xf6   :  { %v835_v3 = vpop.f32.mrb[0].mxu0 }
  0xf7   :  { %v857_v4 = vpop.f32.mrb[0].mxu1  ;;  %v836_v5 = vpop.f32.mrb[1].mxu0 }
  0xf8   :  { %v858_v6 = vpop.f32.mrb[1].mxu1  ;;  %v837_v7 = vadd.f32 %v836_v5, %v835_v3  ;;  %v838_v9 = vpop.f32.mrb[2].mxu0 }
  0xf9   :  { %v859_v8 = vadd.f32 %v858_v6, %v857_v4  ;;  %v860_v10 = vpop.f32.mrb[2].mxu1  ;;  %v839_v11 = vpop.f32.mrb[3].mxu0 }
  0xfa   :  { %v861_v12 = vpop.f32.mrb[3].mxu1 }
  0xfb   :  { %v507_v13 = vadd.f32 %v859_v8, %v837_v7 }
 0x116   :  { %v879_v15 = vpop.f32.mrb[4].mxu0 }
 0x117   :  { %v651_v14 = vpop.f32.mrb[4].mxu1  ;;  %v880_v18 = vpop.f32.mrb[5].mxu0 }
 0x118   :  { %v914_v16 = vpop.f32.mrb[5].mxu1  ;;  %v663_v17 = vmul.f32 %v651_v14, %v651_v14  ;;  %v881_v20 = vadd.f32 %v880_v18, %v879_v15  ;;  %v882_v21 = vpop.f32.mrb[6].mxu0 }
 0x119   :  { %v654_v19 = vpop.f32.mrb[6].mxu1  ;;  %v883_v23 = vpop.f32.mrb[7].mxu0 }
 0x11a   :  { %664 = vadd.xlane.f32.xlu0 %v663_v17  ;;  %v915_v22 = vpop.f32.mrb[7].mxu1  ;;  %v547_v24 = vadd.f32 %v881_v20, %v507_v13 }
 0x11c   :  { %v658_v25 = vmul.f32 %v547_v24, %v547_v24 }
 0x11e   :  { %659 = vadd.xlane.f32.xlu0 %v658_v25 }
 0x1a7   :  { %v665_v26 = vpop.xlane.xlu0 %664 }
 0x1a8   :  { %v666_v27 = vadd.f32 1e-12, %v665_v26 }
 0x1aa   :  { %986 = vrsqrt.f32 %v666_v27 }
 0x1ab   :  { %v660_v28 = vpop.xlane.xlu0 %659 }
 0x1ac   :  { %v661_v29 = vadd.f32 1e-12, %v660_v28 }
 0x1ae   :  { %988 = vrsqrt.f32 %v661_v29 }
 0x1b4   :  { %v987_v30 = vpop.eup %986 }
 0x1b5   :  { %v671_v31 = vmul.f32 %v987_v30, %v651_v14 }
 0x1b7   :  { %v673_v32 = vpack.c.bf16 %v671_v31, %v671_v31 }
 0x1b8   :  { %v989_v34 = vpop.eup %988 }
 0x1b9   :  { %917 = vmatpush3.bf16.xpose.msra.mxu0 %v673_v32  ;;  %v669_v35 = vmul.f32 %v989_v34, %v668_v33 }
 0x1bb   :  { %v670_v36 = vmul.f32 %v669_v35, %v547_v24 }
 0x1bd   :  { %v672_v37 = vpack.c.bf16 %v670_v36, %v670_v36 }
 0x1c0   :  { %919 = vmatmul.mubr.bf16.vlgmr.msra.gmra.mrb[8].mxu0 %v672_v37 }
 0x293   :  { %v708_v38 = vpop.f32.mrb[8].mxu0 }
 0x294   :  { %715 = vst.msk [vmem:[%s1234_s5] sm:$0xff] %vm714_vm1, %v708_v38  ;;  %716 = vxpose.xlu1.b32.start.end [1/1] (short) (narrow) %v708_v38, 8  ;;  %v920_v39 = vpop.f32.mrb[9].mxu0 }
 0x295   :  { %v711_v40 = vpop.f32.mrb[10].mxu0 }
 0x296   :  { %v921_v41 = vpop.f32.mrb[11].mxu0 }
 0x314   :  { %v732_v42 = vpop.trf.xlu1 }
 0x315   :  { %748 = vst.msk [vmem:[%s1235_s6] sm:$0xff] %vm714_vm1, %v732_v42 }

</bundles_post_ra>
